<compile_context>
chip_gen: v6e
topology: v6e:2x2x1
jax: 0.10.0
libtpu: 0.0.40
codegen_flags: <defaults>
</compile_context>

<pallas_src>
import functools

import jax
import jax.numpy as jnp
from jax.experimental import pallas as pl
from jax.experimental.pallas import tpu as pltpu


def _bottleneck_kernel(x_ref, w1_ref, b1_ref, w2_ref, b2_ref, z_ref, xhat_ref):
    # z = relu(x @ W1 + b1) — MXU matmul with f32 accumulation; no operand
    # upcast (bf16 inputs hit the native MXU bf16 path).
    h1 = jnp.dot(x_ref[...], w1_ref[...], preferred_element_type=jnp.float32)
    h1 = h1 + b1_ref[...].astype(jnp.float32)           # (1, lat_p) broadcast
    z = jnp.maximum(h1, 0.0)
    z_ref[...] = z.astype(z_ref.dtype)

    # x_hat = relu(z @ W2 + b2) — cast z to the weight dtype for the MXU.
    h2 = jnp.dot(z.astype(w2_ref.dtype), w2_ref[...],
                 preferred_element_type=jnp.float32)
    h2 = h2 + b2_ref[...].astype(jnp.float32)            # (1, out_p) broadcast
    xhat_ref[...] = jnp.maximum(h2, 0.0).astype(xhat_ref.dtype)


def _round_up(n: int, m: int) -> int:
    return ((n + m - 1) // m) * m


def _sublane(dtype) -> int:
    # Rows per 32-bit sublane: 8 for f32, 16 for bf16, 32 for int8.
    return max(8, 32 // jnp.dtype(dtype).itemsize)


def _vmem_budget_bytes() -> int:
    """~3/4 of physical VMEM: ~96 MiB on v5e/v6e, ~48 MiB on v7x (64 MiB/TC)."""
    try:
        cap = int(pltpu.get_tpu_info().vmem_capacity_bytes)
    except Exception:
        cap = 64 << 20          # conservative fallback (v7x per-core VMEM)
    return (cap * 3) // 4


def pad_bottleneck_params(w1, b1, w2, b2, *, mxu_align=None):
    """Pad weights/biases ONCE (model-init time), not in the per-call path.

    Zero padding is numerically exact: padded W1 columns / b1 entries give
    z_pad = relu(0) = 0 and the matching zero rows of W2 contribute nothing
    to x_hat. Returns (padded_params, (in_units, latent, out_units)).
    """
    in_units, latent = w1.shape
    out_units = w2.shape[1]
    if mxu_align is None:
        # 256 matches the 256x256 MXU on v6e/v7x; only worth the extra padded
        # flops when the layer is wide enough to be compute-bound.
        mxu_align = 256 if min(latent, out_units) >= 1024 else 128
    sub_k = _sublane(w1.dtype)
    in_p = _round_up(in_units, sub_k)
    lat_p = _round_up(latent, mxu_align)
    out_p = _round_up(out_units, mxu_align)
    w1_p = jnp.pad(w1, ((0, in_p - in_units), (0, lat_p - latent)))
    b1_p = jnp.pad(jnp.reshape(b1, (1, -1)), ((0, 0), (0, lat_p - latent)))
    w2_p = jnp.pad(w2, ((0, lat_p - latent), (0, out_p - out_units)))
    b2_p = jnp.pad(jnp.reshape(b2, (1, -1)), ((0, 0), (0, out_p - out_units)))
    return (w1_p, b1_p, w2_p, b2_p), (in_units, latent, out_units)


@functools.partial(jax.jit,
                   static_argnames=("dims", "tb_max", "return_padded"))
def basic_bottleneck(x, w1_p, b1_p, w2_p, b2_p, *, dims, tb_max=512,
                     return_padded=False):
    """x: (B, in_units); padded params from pad_bottleneck_params.
    Returns (z, x_hat) == (relu(x@W1+b1), relu(z@W2+b2))."""
    B, in_units = x.shape
    in_units_dims, latent, out_units = dims
    assert in_units_dims == in_units
    in_p, lat_p = w1_p.shape
    out_p = w2_p.shape[1]

    # Pad K only when misaligned (extra pass over x; skipped in the common case).
    if in_p != in_units:
        x = jnp.pad(x, ((0, 0), (0, in_p - in_units)))

    out_dtype = x.dtype
    x_item = jnp.dtype(x.dtype).itemsize
    w_item = jnp.dtype(w1_p.dtype).itemsize
    o_item = jnp.dtype(out_dtype).itemsize

    # --- VMEM-budget-aware batch tile -------------------------------------
    vmem_budget = _vmem_budget_bytes()
    # Weights are single-buffered (Buffered(1)), so they count once.
    weight_bytes = (w1_p.size + b1_p.size + w2_p.size + b2_p.size) * w_item
    # Double-buffered x / z / x_hat bytes per batch row.
    row_bytes = 2 * (in_p * x_item + (lat_p + out_p) * o_item)
    sub = _sublane(x.dtype)
    avail = vmem_budget - weight_bytes
    # TODO(synk): if the resident weights alone exceed the VMEM budget, the
    # latent/out dims would need their own grid axis; not implemented here.
    tb_fit = max(sub, (max(avail, sub * row_bytes) // row_bytes) // sub * sub)
    tb_cap = max(sub, min(tb_max, tb_fit))

    # Balanced tiles; >= 2 (even #) tiles when B allows so both v7x TCs work.
    n_tiles = pl.cdiv(B, tb_cap)
    if B >= 2 * sub:
        n_tiles = max(n_tiles, 2)
        n_tiles += n_tiles % 2
    tb = _round_up(pl.cdiv(B, n_tiles), sub)
    grid = (pl.cdiv(B, tb),)

    cost = pl.CostEstimate(
        flops=2 * B * (in_p * lat_p + lat_p * out_p),
        transcendentals=0,
        bytes_accessed=(x.size * x_item
                        + weight_bytes
                        + B * (lat_p + out_p) * o_item),
    )

    z_p, xhat_p = pl.pallas_call(
        _bottleneck_kernel,
        out_shape=(
            jax.ShapeDtypeStruct((B, lat_p), out_dtype),
            jax.ShapeDtypeStruct((B, out_p), out_dtype),
        ),
        grid_spec=pltpu.PrefetchScalarGridSpec(
            num_scalar_prefetch=0,
            grid=grid,
            in_specs=[
                # x: per-batch-tile, default double-buffered pipeline.
                pl.BlockSpec((tb, in_p), lambda i: (i, 0)),
                # Weights/biases: constant block index -> VMEM-resident; a
                # single buffer is enough (nothing to double-buffer).
                pl.BlockSpec((in_p, lat_p), lambda i: (0, 0),
                             pipeline_mode=pl.Buffered(1)),
                pl.BlockSpec((1, lat_p), lambda i: (0, 0),
                             pipeline_mode=pl.Buffered(1)),
                pl.BlockSpec((lat_p, out_p), lambda i: (0, 0),
                             pipeline_mode=pl.Buffered(1)),
                pl.BlockSpec((1, out_p), lambda i: (0, 0),
                             pipeline_mode=pl.Buffered(1)),
            ],
            out_specs=[
                pl.BlockSpec((tb, lat_p), lambda i: (i, 0)),
                pl.BlockSpec((tb, out_p), lambda i: (i, 0)),
            ],
        ),
        compiler_params=pltpu.CompilerParams(
            dimension_semantics=("parallel",),   # v7x: both TCs take tiles
            vmem_limit_bytes=int(vmem_budget),   # overrides v5e's 16 MiB default
        ),
        cost_estimate=cost,
    )(x, w1_p, b1_p, w2_p, b2_p)

    if return_padded or (lat_p == latent and out_p == out_units):
        return z_p, xhat_p
    # Feature-dim slices cost an extra pass over each output; pass
    # return_padded=True when the consumer can handle the zero padding.
    return z_p[:, :latent], xhat_p[:, :out_units]


def reference(x, w1, b1, w2, b2):
    z = jnp.maximum(x @ w1 + b1, 0.0)
    x_hat = jnp.maximum(z @ w2 + b2, 0.0)
    return z, x_hat


if __name__ == "__main__":
    key = jax.random.PRNGKey(0)
    batch, in_units, latent, out_units = 4, 32, 16, 32

    k = jax.random.split(key, 5)
    x = jax.random.normal(k[0], (batch, in_units), dtype=jnp.float32)
    # Deterministic init mimicking nn.Linear's uniform(-1/sqrt(fan_in), +1/sqrt(fan_in)).
    lim1 = 1.0 / jnp.sqrt(in_units)
    lim2 = 1.0 / jnp.sqrt(latent)
    w1 = jax.random.uniform(k[1], (in_units, latent), jnp.float32, -lim1, lim1)
    b1 = jax.random.uniform(k[2], (1, latent), jnp.float32, -lim1, lim1)
    w2 = jax.random.uniform(k[3], (latent, out_units), jnp.float32, -lim2, lim2)
    b2 = jax.random.uniform(k[4], (1, out_units), jnp.float32, -lim2, lim2)

    # Pad weights once (model-init time), then call the kernel.
    (w1_p, b1_p, w2_p, b2_p), dims = pad_bottleneck_params(w1, b1, w2, b2)
    z, x_hat = basic_bottleneck(x, w1_p, b1_p, w2_p, b2_p, dims=dims)
    jax.block_until_ready((z, x_hat))

    z_ref, xhat_ref = reference(x, w1, b1, w2, b2)
    assert z.shape == z_ref.shape and x_hat.shape == xhat_ref.shape
    assert jnp.allclose(z, z_ref, atol=1e-5, rtol=1e-5)
    assert jnp.allclose(x_hat, xhat_ref, atol=1e-5, rtol=1e-5)
    print("KERNEL_OK")
</pallas_src>

<mosaic_0001>
module attributes {stable_mosaic.version = 11 : i64} {
  func.func @_bottleneck_kernel(%arg0: i32, %arg1: memref<8x32xf32, #tpu.memory_space<vmem>>, %arg2: memref<32x128xf32, #tpu.memory_space<vmem>>, %arg3: memref<1x128xf32, #tpu.memory_space<vmem>>, %arg4: memref<128x128xf32, #tpu.memory_space<vmem>>, %arg5: memref<1x128xf32, #tpu.memory_space<vmem>>, %arg6: memref<8x128xf32, #tpu.memory_space<vmem>>, %arg7: memref<8x128xf32, #tpu.memory_space<vmem>>) attributes {dimension_semantics = [#tpu.dimension_semantics<parallel>], iteration_bounds = array<i64: 1>, scalar_prefetch = 0 : i64, scratch_operands = 0 : i64, tpu.core_type = #tpu.core_type<tc>, window_params = [{transform_indices = @transform_0, window_bounds = array<i64: 8, 32>}, {pipeline_mode = #tpu.pipeline_mode<synchronous>, transform_indices = @transform_1, window_bounds = array<i64: 32, 128>}, {pipeline_mode = #tpu.pipeline_mode<synchronous>, transform_indices = @transform_2, window_bounds = array<i64: 1, 128>}, {pipeline_mode = #tpu.pipeline_mode<synchronous>, transform_indices = @transform_3, window_bounds = array<i64: 128, 128>}, {pipeline_mode = #tpu.pipeline_mode<synchronous>, transform_indices = @transform_4, window_bounds = array<i64: 1, 128>}, {transform_indices = @transform_5, window_bounds = array<i64: 8, 128>}, {transform_indices = @transform_6, window_bounds = array<i64: 8, 128>}]} {
    %c0 = arith.constant 0 : index
    %c0_0 = arith.constant 0 : index
    %0 = vector.load %arg1[%c0, %c0_0] : memref<8x32xf32, #tpu.memory_space<vmem>>, vector<8x32xf32>
    %c0_1 = arith.constant 0 : index
    %c0_2 = arith.constant 0 : index
    %1 = vector.load %arg2[%c0_1, %c0_2] : memref<32x128xf32, #tpu.memory_space<vmem>>, vector<32x128xf32>
    %cst = arith.constant dense<0.000000e+00> : vector<8x128xf32>
    %2 = tpu.matmul %0, %1, %cst {dimension_numbers = #tpu.dot_dimension_numbers<[1], [0], [0], [1], [0, 0, 1, 1], [], []>} : vector<8x32xf32>, vector<32x128xf32>, vector<8x128xf32> -> vector<8x128xf32>
    %c0_3 = arith.constant 0 : index
    %c0_4 = arith.constant 0 : index
    %3 = vector.load %arg3[%c0_3, %c0_4] : memref<1x128xf32, #tpu.memory_space<vmem>>, vector<1x128xf32>
    %4 = vector.broadcast %3 : vector<1x128xf32> to vector<8x128xf32>
    %5 = arith.addf %2, %4 : vector<8x128xf32>
    %cst_5 = arith.constant 0.000000e+00 : f32
    %6 = vector.broadcast %cst_5 : f32 to vector<8x128xf32>
    %7 = arith.maximumf %5, %6 : vector<8x128xf32>
    %c0_6 = arith.constant 0 : index
    %c0_7 = arith.constant 0 : index
    %8 = vector.load %arg6[%c0_6, %c0_7] : memref<8x128xf32, #tpu.memory_space<vmem>>, vector<8x128xf32>
    tpu.vector_store %arg6[%c0_6, %c0_7], %7 {strides = array<i32>} : memref<8x128xf32, #tpu.memory_space<vmem>>, vector<8x128xf32>,
    %c0_8 = arith.constant 0 : index
    %c0_9 = arith.constant 0 : index
    %9 = vector.load %arg4[%c0_8, %c0_9] : memref<128x128xf32, #tpu.memory_space<vmem>>, vector<128x128xf32>
    %cst_10 = arith.constant dense<0.000000e+00> : vector<8x128xf32>
    %10 = tpu.matmul %7, %9, %cst_10 {dimension_numbers = #tpu.dot_dimension_numbers<[1], [0], [0], [1], [0, 0, 1, 1], [], []>} : vector<8x128xf32>, vector<128x128xf32>, vector<8x128xf32> -> vector<8x128xf32>
    %c0_11 = arith.constant 0 : index
    %c0_12 = arith.constant 0 : index
    %11 = vector.load %arg5[%c0_11, %c0_12] : memref<1x128xf32, #tpu.memory_space<vmem>>, vector<1x128xf32>
    %12 = vector.broadcast %11 : vector<1x128xf32> to vector<8x128xf32>
    %13 = arith.addf %10, %12 : vector<8x128xf32>
    %cst_13 = arith.constant 0.000000e+00 : f32
    %14 = vector.broadcast %cst_13 : f32 to vector<8x128xf32>
    %15 = arith.maximumf %13, %14 : vector<8x128xf32>
    %c0_14 = arith.constant 0 : index
    %c0_15 = arith.constant 0 : index
    %16 = vector.load %arg7[%c0_14, %c0_15] : memref<8x128xf32, #tpu.memory_space<vmem>>, vector<8x128xf32>
    tpu.vector_store %arg7[%c0_14, %c0_15], %15 {strides = array<i32>} : memref<8x128xf32, #tpu.memory_space<vmem>>, vector<8x128xf32>,
    return
  }
  func.func @transform_0(%arg0: i32) -> (i32, i32) {
    %c0_i32 = arith.constant 0 : i32
    %c0_i32_0 = arith.constant 0 : i32
    return %arg0, %c0_i32 : i32, i32
  }
  func.func @transform_1(%arg0: i32) -> (i32, i32) {
    %c0_i32 = arith.constant 0 : i32
    %c0_i32_0 = arith.constant 0 : i32
    %c0_i32_1 = arith.constant 0 : i32
    return %c0_i32, %c0_i32_0 : i32, i32
  }
  func.func @transform_2(%arg0: i32) -> (i32, i32) {
    %c0_i32 = arith.constant 0 : i32
    %c0_i32_0 = arith.constant 0 : i32
    %c0_i32_1 = arith.constant 0 : i32
    return %c0_i32, %c0_i32_0 : i32, i32
  }
  func.func @transform_3(%arg0: i32) -> (i32, i32) {
    %c0_i32 = arith.constant 0 : i32
    %c0_i32_0 = arith.constant 0 : i32
    %c0_i32_1 = arith.constant 0 : i32
    return %c0_i32, %c0_i32_0 : i32, i32
  }
  func.func @transform_4(%arg0: i32) -> (i32, i32) {
    %c0_i32 = arith.constant 0 : i32
    %c0_i32_0 = arith.constant 0 : i32
    %c0_i32_1 = arith.constant 0 : i32
    return %c0_i32, %c0_i32_0 : i32, i32
  }
  func.func @transform_5(%arg0: i32) -> (i32, i32) {
    %c0_i32 = arith.constant 0 : i32
    %c0_i32_0 = arith.constant 0 : i32
    return %arg0, %c0_i32 : i32, i32
  }
  func.func @transform_6(%arg0: i32) -> (i32, i32) {
    %c0_i32 = arith.constant 0 : i32
    %c0_i32_0 = arith.constant 0 : i32
    return %arg0, %c0_i32 : i32, i32
  }
}

</mosaic_0001>

<bundles_post_ra>
// kernel: basic_bottleneck.1
= control target key start
LH: loop header
LB: loop body
LE: loop exit
PB: predicated region body
PF: predicated region fallthrough
CT: control target
= control target key end

     0   :  { %12 = vsyncpa [#allocation3], 0  ;;  %s576_s0 = inlined_call_operand.hbm [shape: f32[4,32], index: 0, kind: input, shape index: {}]   ;;  %s577_s1 = inlined_call_operand.hbm [shape: f32[32,128], index: 1, kind: input, shape index: {}]   ;;  %s578_s2 = inlined_call_operand.vmem [shape: f32[1,128], index: 2, kind: input, shape index: {}]   ;;  %s579_s3 = inlined_call_operand.hbm [shape: f32[128,128], index: 3, kind: input, shape index: {}]   ;;  %s580_s4 = inlined_call_operand.vmem [shape: f32[1,128], index: 4, kind: input, shape index: {}]   ;;  %s581_s5 = inlined_call_operand.hbm [shape: f32[4,128], index: 5, kind: output, shape index: {0}]   ;;  %s582_s6 = inlined_call_operand.hbm [shape: f32[4,128], index: 6, kind: output, shape index: {1}]  }
   0x1   :  { %13 = vsyncpa [#allocation6], 0 }
   0x2   :  { %14 = vsyncpa [#allocation4], 0 }
   0x3   :  { %15 = vsyncpa [#allocation10], 0 }
   0x4   :  { %20 = vsyncadd [#allocation3], 64  ;;  %s472_s21 = smov [#allocation5]  }
   0x5   :  { %s33_s22 = sshll.u32 %s472_s21, 4  ;;  %s34_s22 = int_to_ptr.vmem [resolvable:$true] %s33_s22 }
   0x6   :  { %s372_s23 = scalar_lea.vmem %s34_s22, 512  ;;  %p377_p1 = scmp.lt.s32.totalorder %s34_s22, %s34_s22 }
   0x7   :  { %p373_p0 = scmp.ne.s32.totalorder %s34_s22, %s372_s23  ;;  %p378_p2 = scmp.lt.s32.totalorder %s372_s23, %s372_s23 }
   0x9   :  { %p379_p3 = por %p378_p2, %p377_p1 }
   0xb   :  { %p380_p4 = pnand %p379_p3, %p373_p0 }
   0xd   :  { %383 = shalt.err (!%p380_p4)
}
   0xe   :  { %s473_s24 = smov 128   ;;  %s474_s25 = smov 8  }
   0xf   :  { %39 = dma.hbm_to_vmem [thread:$0]  %s577_s1, 512, %s34_s22, [#allocation6], %s473_s24, %s473_s24, %s474_s25  }
  0x10   :  { %s475_s28 = smov [#allocation2]  }
  0x11   :  { %s21_s29 = sshll.u32 %s475_s28, 4  ;;  %s22_s29 = int_to_ptr.vmem [resolvable:$true] %s21_s29 }
  0x12   :  { %s392_s30 = scalar_lea.vmem %s22_s29, 64  ;;  %s396_s7 = scalar_lea.vmem %s22_s29, 128 }
  0x13   :  { %p393_p5 = scmp.ne.s32.totalorder %s22_s29, %s392_s30  ;;  %p397_p6 = scmp.lt.s32.totalorder %s22_s29, %s22_s29 }
  0x14   :  { %p398_p7 = scmp.lt.s32.totalorder %s396_s7, %s392_s30 }
  0x16   :  { %p399_p8 = por %p398_p7, %p397_p6 }
  0x18   :  { %p400_p9 = pnand %p399_p8, %p393_p5 }
  0x1a   :  { %403 = shalt.err (!%p400_p9)
}
  0x1b   :  { %s476_s8 = smov 64   ;;  %s477_s9 = smov 4  }
  0x1c   :  { %27 = dma.hbm_to_vmem [thread:$0]  %s576_s0, 64, %s22_s29, [#allocation3], %s476_s8, %s476_s8, %s477_s9  }
  0x1d   :  { %s478_s1 = smov [#allocation7]  }
  0x1e   :  { %s47_s12 = sshll.u32 %s478_s1, 4  ;;  %s48_s12 = int_to_ptr.vmem [resolvable:$true] %s47_s12 }
  0x1f   :  { %s412_s13 = scalar_lea.vmem %s48_s12, 2048  ;;  %p417_p11 = scmp.lt.s32.totalorder %s48_s12, %s48_s12 }
  0x20   :  { %p413_p10 = scmp.ne.s32.totalorder %s48_s12, %s412_s13  ;;  %p418_p12 = scmp.lt.s32.totalorder %s412_s13, %s412_s13 }
  0x22   :  { %p419_p13 = por %p418_p12, %p417_p11 }
  0x24   :  { %p420_p0 = pnand %p419_p13, %p413_p10 }
  0x26   :  { %423 = shalt.err (!%p420_p0)
}
  0x27   :  { %53 = dma.hbm_to_vmem [thread:$0]  %s579_s3, 2048, %s48_s12, [#allocation6], %s473_s24, %s473_s24, %s474_s25  }
  0x28   :  { %464 = dma.done.wait [#allocation3], 128  }
  0x29   :  { %465 = vsyncadd [#allocation3], 4294967168 }
  0x2a   :  { %466 = dma.done.wait [#allocation6], 2560  }
  0x2b   :  { %467 = vsyncadd [#allocation6], 4294964736  ;;  %v479_v0 = vmov 0.0   ;;  %vm480_vm0 = vmmov 0   ;;  %v69_v1 = vld [vmem:[#allocation5 + $0x18] sm:$0xff]  ;;  %v68_v2 = vld [vmem:[#allocation5 + $0x10] sm:$0xff] }
  0x2c   :  { %307 = vmatprep.subr.mxu0 %v479_v0  ;;  %315 = vmatprep.mubr.msk.f32.mxu0 %vm480_vm0, %v479_v0  ;;  %v168_v3 = vld [vmem:[#allocation7 + $0x78] sm:$0xff]  ;;  %v67_v4 = vld [vmem:[#allocation5 + $0x8] sm:$0xff]  ;;  %v167_v5 = vld [vmem:[#allocation7 + $0x70] sm:$0xff]  ;;  %vm77_vm1 = vcmask 261120  }
  0x2d   :  { %318 = vmatprep.subr.mxu1 %v479_v0  ;;  %350 = vmatprep.mubr.msk.f32.mxu1 %vm480_vm0, %v479_v0  ;;  %v166_v6 = vld [vmem:[#allocation7 + $0x68] sm:$0xff]  ;;  %v66_v7 = vld [vmem:[#allocation5] sm:$0xff]  ;;  %v65_v8 = vld [vmem:[#allocation2] sm:$0xff] }
  0x2e   :  { %308 = vmatpush3.msra.mxu0 %v69_v1  ;;  %319 = vmatpush3.msra.mxu1 %v168_v3  ;;  %v165_v9 = vld [vmem:[#allocation7 + $0x60] sm:$0xff]  ;;  %v164_v10 = vld [vmem:[#allocation7 + $0x58] sm:$0xff]  ;;  %v163_v11 = vld [vmem:[#allocation7 + $0x50] sm:$0xff] }
  0x2f   :  { %309 = vmatprep.subr.mxu0 %v479_v0  ;;  %320 = vmatprep.subr.mxu1 %v479_v0  ;;  %v162_v12 = vld [vmem:[#allocation7 + $0x48] sm:$0xff]  ;;  %v161_v13 = vld [vmem:[#allocation7 + $0x40] sm:$0xff]  ;;  %v160_v14 = vld [vmem:[#allocation7 + $0x38] sm:$0xff] }
  0x30   :  { %310 = vmatpush3.msra.mxu0 %v68_v2  ;;  %321 = vmatpush3.msra.mxu1 %v167_v5  ;;  %v159_v15 = vld [vmem:[#allocation7 + $0x30] sm:$0xff]  ;;  %v158_v16 = vld [vmem:[#allocation7 + $0x28] sm:$0xff]  ;;  %v157_v17 = vld [vmem:[#allocation7 + $0x20] sm:$0xff] }
  0x31   :  { %311 = vmatprep.subr.mxu0 %v479_v0  ;;  %322 = vmatprep.subr.mxu1 %v479_v0  ;;  %v156_v18 = vld [vmem:[#allocation7 + $0x18] sm:$0xff]  ;;  %v155_v19 = vld [vmem:[#allocation7 + $0x10] sm:$0xff]  ;;  %v154_v20 = vld [vmem:[#allocation7 + $0x8] sm:$0xff] }
  0x32   :  { %312 = vmatpush3.msra.mxu0 %v67_v4  ;;  %323 = vmatpush3.msra.mxu1 %v166_v6  ;;  %v153_v21 = vld [vmem:[#allocation7] sm:$0xff]  ;;  %v282_v22 = vld [vmem:[%s578_s2] ss:$0 sm:$0xff] }
  0x33   :  { %313 = vmatprep.subr.mxu0 %v479_v0  ;;  %324 = vmatprep.subr.mxu1 %v479_v0  ;;  %v284_v27 = vld [vmem:[%s580_s4] ss:$0 sm:$0xff] }
  0x34   :  { %314 = vmatpush3.msra.mxu0 %v66_v7  ;;  %325 = vmatpush3.msra.mxu1 %v165_v9 }
  0x35   :  { %316 = vmatmul.mubr.msk.f32.vlgmr.msra.gmra.mxu0 %vm77_vm1, %v65_v8  ;;  %326 = vmatprep.subr.mxu1 %v479_v0 }
  0x36   :  { %327 = vmatpush3.msra.mxu1 %v164_v10 }
  0x37   :  { %328 = vmatprep.subr.mxu1 %v479_v0 }
  0x38   :  { %329 = vmatpush3.msra.mxu1 %v163_v11 }
  0x39   :  { %330 = vmatprep.subr.mxu1 %v479_v0 }
  0x3a   :  { %331 = vmatpush3.msra.mxu1 %v162_v12 }
  0x3b   :  { %332 = vmatprep.subr.mxu1 %v479_v0 }
  0x3c   :  { %333 = vmatpush3.msra.mxu1 %v161_v13 }
  0x3d   :  { %334 = vmatprep.subr.mxu1 %v479_v0 }
  0x3e   :  { %335 = vmatpush3.msra.mxu1 %v160_v14 }
  0x3f   :  { %336 = vmatprep.subr.mxu1 %v479_v0 }
  0x40   :  { %337 = vmatpush3.msra.mxu1 %v159_v15 }
  0x41   :  { %338 = vmatprep.subr.mxu1 %v479_v0 }
  0x42   :  { %339 = vmatpush3.msra.mxu1 %v158_v16 }
  0x43   :  { %340 = vmatprep.subr.mxu1 %v479_v0 }
  0x44   :  { %341 = vmatpush3.msra.mxu1 %v157_v17 }
  0x45   :  { %342 = vmatprep.subr.mxu1 %v479_v0 }
  0x46   :  { %343 = vmatpush3.msra.mxu1 %v156_v18 }
  0x47   :  { %344 = vmatprep.subr.mxu1 %v479_v0 }
  0x48   :  { %345 = vmatpush3.msra.mxu1 %v155_v19 }
  0x49   :  { %346 = vmatprep.subr.mxu1 %v479_v0 }
  0x4a   :  { %347 = vmatpush3.msra.mxu1 %v154_v20 }
  0x4b   :  { %348 = vmatprep.subr.mxu1 %v479_v0 }
  0x4c   :  { %349 = vmatpush3.msra.mxu1 %v153_v21 }
  0xf5   :  { %v147_v23 = vpop.f32.mrf.mxu0 }
  0xf6   :  { %v148_v24 = vadd.f32 %v282_v22, %v147_v23 }
  0xf7   :  { %v317_v25 = vpop.f32.mrf.mxu0 }
  0xf8   :  { %v151_v26 = vmax.f32 %v148_v24, 0.0 }
  0xfa   :  { %152 = vst [vmem:[#allocation8] sm:$0xff] %v151_v26  ;;  %351 = vmatmul.mubr.f32.vlgmr.msra.gmra.mxu1 %v151_v26 }
 0x1ba   :  { %v242_v28 = vpop.f32.mrf.mxu1 }
 0x1bb   :  { %v243_v29 = vadd.f32 %v284_v27, %v242_v28 }
 0x1bc   :  { %v352_v30 = vpop.f32.mrf.mxu1 }
 0x1bd   :  { %v246_v31 = vmax.f32 %v243_v29, 0.0 }
 0x1bf   :  { %247 = vst [vmem:[#allocation9] sm:$0xff] %v246_v31 }
 0x1c0   :  { %252 = vsyncadd [#allocation4], 64  ;;  %s481_s18 = smov [#allocation8]  }
 0x1c1   :  { %s253_s19 = sshll.u32 %s481_s18, 4  ;;  %s254_s19 = int_to_ptr.vmem [resolvable:$true] %s253_s19 }
 0x1c2   :  { %s424_s2 = scalar_lea.vmem %s254_s19, 64  ;;  %s428_s20 = scalar_lea.vmem %s254_s19, 128 }
 0x1c3   :  { %p425_p1 = scmp.ne.s32.totalorder %s254_s19, %s424_s2  ;;  %p429_p2 = scmp.lt.s32.totalorder %s254_s19, %s254_s19 }
 0x1c4   :  { %p430_p3 = scmp.lt.s32.totalorder %s428_s20, %s424_s2 }
 0x1c6   :  { %p431_p4 = por %p430_p3, %p429_p2 }
 0x1c8   :  { %p432_p5 = pnand %p431_p4, %p425_p1 }
 0x1ca   :  { %435 = shalt.err (!%p432_p5)
}
 0x1cb   :  { %259 = dma.vmem_to_hbm [thread:$0]  %s254_s19, 64, %s581_s5, [#allocation4], %s476_s8, %s476_s8, %s477_s9  }
 0x1cc   :  { %264 = vsyncadd [#allocation10], 64  ;;  %s482_s22 = smov [#allocation9]  }
 0x1cd   :  { %s265_s23 = sshll.u32 %s482_s22, 4  ;;  %s266_s23 = int_to_ptr.vmem [resolvable:$true] %s265_s23 }
 0x1ce   :  { %s444_s24 = scalar_lea.vmem %s266_s23, 64  ;;  %s448_s25 = scalar_lea.vmem %s266_s23, 128 }
 0x1cf   :  { %p445_p6 = scmp.ne.s32.totalorder %s266_s23, %s444_s24  ;;  %p449_p7 = scmp.lt.s32.totalorder %s266_s23, %s266_s23 }
 0x1d0   :  { %p450_p8 = scmp.lt.s32.totalorder %s448_s25, %s444_s24 }
 0x1d2   :  { %p451_p9 = por %p450_p8, %p449_p7 }
 0x1d4   :  { %p452_p10 = pnand %p451_p9, %p445_p6 }
 0x1d6   :  { %455 = shalt.err (!%p452_p10)
}
 0x1d7   :  { %271 = dma.vmem_to_hbm [thread:$0]  %s266_s23, 64, %s582_s6, [#allocation10], %s476_s8, %s476_s8, %s477_s9  }
 0x1d8   :  { %468 = dma.done.wait [#allocation4], 128  }
 0x1d9   :  { %469 = vsyncadd [#allocation4], 4294967168 }
 0x1da   :  { %470 = dma.done.wait [#allocation10], 128  }
 0x1db   :  { %471 = vsyncadd [#allocation10], 4294967168 }
 0x1dc   :  { %278 = vsyncpa [#allocation3], 1 }
 0x1dd   :  { %279 = vsyncpa [#allocation6], 1 }
 0x1de   :  { %280 = vsyncpa [#allocation4], 1 }
 0x1df   :  { %281 = vsyncpa [#allocation10], 1 }

</bundles_post_ra>
